<compile_context>
chip_gen: v6e
topology: v6e:2x2x1
jax: 0.10.0
libtpu: 0.0.40
codegen_flags: <defaults>
</compile_context>

<pallas_src>
import functools

import jax
import jax.numpy as jnp
from jax.experimental import pallas as pl
from jax.experimental.pallas import tpu as pltpu

LANE = 128  # TPU lane width; answer-logit output is padded to a multiple of this.


def _round_up(x, m):
    return (x + m - 1) // m * m


# ----------------------------------------------------------------------------
# Kernel: synthetic MaskedLM encoder + answer-restricted LM head.
# One grid step processes a tile of `Bt` examples; only the last-[MASK] row of
# each example flows past the K/V projection.
# ----------------------------------------------------------------------------
def mlm_answer_logits_kernel(lm_ref,                           # (Bt, 1)  i32 last-mask pos
                             x_ref,                            # (Bt, S, H) bf16 embeddings
                             amask_ref,                        # (Bt, 1, S) f32 attention mask
                             wq_ref,                           # (H, H)   bf16
                             wkv_ref,                          # (H, 2H)  bf16 fused Wk|Wv
                             wo_ref,                           # (H, H)   bf16
                             w1_ref, w2_ref,                   # (H, F), (F, H) bf16
                             ln_ref,                           # (4, H)   f32
                             head_ref,                         # (H, A_pad) bf16 answer cols of E^T
                             hbias_ref,                        # (1, A_pad) f32
                             out_ref):                         # (Bt, A_pad) f32
    bt, s, h = x_ref.shape
    bf16, f32 = jnp.bfloat16, jnp.float32

    def mm(a, b):  # bf16 x bf16 matmul with f32 accumulation (MXU)
        return jnp.dot(a, b, preferred_element_type=f32)

    x3 = x_ref[...]                              # (Bt, S, H) bf16
    x2 = x3.reshape(bt * s, h)                   # big MXU M dim for K/V

    # --- full-sequence K/V projection: one fused (H,2H) MXU pass ---
    kv = mm(x2, wkv_ref[...]).astype(bf16)       # (Bt*S, 2H)
    k3 = kv[:, :h].reshape(bt, s, h)
    v3 = kv[:, h:].reshape(bt, s, h)

    # --- gather the last-[MASK] embedding row per example (one-hot MXU pick) ---
    lm = lm_ref[...]                                             # (Bt, 1) i32
    col = jax.lax.broadcasted_iota(jnp.int32, (bt, 1, s), 2)     # (Bt, 1, S)
    onehot = (col == lm[:, :, None]).astype(bf16)                # (Bt, 1, S)
    x_sel = jnp.einsum("bqs,bsh->bqh", onehot, x3,
                       preferred_element_type=f32)               # (Bt, 1, H), exact pick
    x_sel2 = x_sel.reshape(bt, h)                                # (Bt, H) f32

    # --- single-head attention, queries restricted to the selected rows ---
    q = mm(x_sel2.astype(bf16), wq_ref[...]).astype(bf16).reshape(bt, 1, h)
    scale = 1.0 / (h ** 0.5)
    scores = jnp.einsum("bqd,bkd->bqk", q, k3,
                        preferred_element_type=f32) * scale      # (Bt, 1, S)
    scores = scores + (amask_ref[...] - 1.0) * 1e9               # mask padded keys
    scores = scores - jnp.max(scores, axis=-1, keepdims=True)
    p = jnp.exp(scores)
    # EUP approx reciprocal instead of a VALU divide
    p = p * pl.reciprocal(jnp.sum(p, axis=-1, keepdims=True), approx=True)
    attn = jnp.einsum("bqk,bkd->bqd", p.astype(bf16), v3,
                      preferred_element_type=f32)                # (Bt, 1, H)
    attn_o = mm(attn.reshape(bt, h).astype(bf16), wo_ref[...])   # (Bt, H) f32

    ln = ln_ref[...]                     # (4,H): gamma1, beta1, gamma2, beta2

    def layer_norm(hid, gamma, beta):    # f32 statistics
        mu = jnp.mean(hid, axis=-1, keepdims=True)
        var = jnp.mean((hid - mu) ** 2, axis=-1, keepdims=True)
        return (hid - mu) * jax.lax.rsqrt(var + 1e-5) * gamma + beta

    h1 = layer_norm(x_sel2 + attn_o, ln[0:1, :], ln[1:2, :])     # (Bt, H)

    # --- feed-forward (selected rows only) ---
    ff = mm(h1.astype(bf16), w1_ref[...])
    ff = jax.nn.gelu(ff, approximate=True)
    ff = mm(ff.astype(bf16), w2_ref[...])
    h2 = layer_norm(h1 + ff, ln[2:3, :], ln[3:4, :])             # (Bt, H)

    # --- answer-restricted tied-embedding LM head (lane-dense output) ---
    logits = mm(h2.astype(bf16), head_ref[...]) + hbias_ref[...]
    out_ref[...] = logits                # (Bt, A_pad), unmasked vst stores


def _pick_batch_tile(B, S, *, max_tile=64, target_rows=256):
    """Tile must divide B; when splitting it is a multiple of 8; aim for
    Bt*S >= target_rows MXU rows and >= 2 grid steps (v7x megacore)."""
    if B % 8 != 0 or B <= 8:
        return B                                   # small/ragged batch: one tile
    want = min(max_tile, max(8, _round_up((target_rows + S - 1) // S, 8)))
    bt = 8
    for d in range(8, min(want, B) + 1, 8):
        if B % d == 0:
            bt = d
    if B // bt < 2:                                # leave work for both TCs
        for d in range(bt - 8, 7, -8):
            if B % d == 0:
                bt = d
                break
    return bt


def _const_spec(shape, *, single_buffer):
    """Constant index_map -> Pallas keeps the weight tile resident (no re-DMA).
    When weights are large, also request single-buffering to halve their VMEM."""
    index_map = lambda b, _shape_len=len(shape): (0,) * _shape_len
    if single_buffer and hasattr(pl, "Buffered"):
        try:
            return pl.BlockSpec(shape, index_map,
                                pipeline_mode=pl.Buffered(buffer_count=1))
        except TypeError:          # older jax without pipeline_mode
            pass
    return pl.BlockSpec(shape, index_map)


def mlm_answer_logits(emb, amask3, last_mask, wq, wkv, wo, w1, w2, ln,
                      head, hbias):
    """emb (B,S,H) bf16, amask3 (B,1,S) f32, last_mask (B,1) i32,
       head (H,A_pad) bf16, hbias (1,A_pad) f32  ->  (B, A_pad) f32."""
    B, S, H = emb.shape
    F = w1.shape[1]
    a_pad = head.shape[1]

    bt = _pick_batch_tile(B, S)
    grid = (B // bt,)

    # ---- VMEM budget / buffering policy --------------------------------------
    weight_bytes = ((wq.size + wkv.size + wo.size + w1.size + w2.size
                     + head.size) * 2 + (ln.size + hbias.size) * 4)
    # Only bother constraining buffering when weights are big enough to matter
    # for the 64 MiB v7x VMEM; the tiny smoke-test keeps the default path.
    single_buffer = weight_bytes > (4 << 20)

    act_tile = bt * S * H * 2 + bt * S * 4 + bt * 4          # emb + mask + lm
    out_tile = bt * a_pad * 4
    inter = (bt * S * 2 * H * 6          # K/V projection f32 + bf16 copies
             + bt * S * 4                # scores row
             + bt * F * 4                # GELU activations (selected rows only)
             + 8 * bt * H * 4)           # misc selected-row f32 temporaries
    need = ((1 if single_buffer else 2) * weight_bytes
            + 2 * (act_tile + out_tile) + inter + (4 << 20))
    try:
        cap = int(pltpu.get_tpu_info().vmem_capacity_bytes) * 7 // 8
    except Exception:                    # pragma: no cover - conservative default
        cap = 56 << 20                   # safe under v7x's 64 MiB physical VMEM
    vmem_bytes = int(max(16 << 20, min(need, cap)))

    # ---- advisory cost estimate so XLA overlaps the surrounding glue ops ------
    flops = (2 * B * S * H * 2 * H       # fused K/V projection
             + 2 * B * S * H             # one-hot row gather
             + 2 * B * H * H             # Q (selected rows)
             + 4 * B * S * H             # scores + attn@V
             + 2 * B * H * H             # Wo
             + 4 * B * H * F             # FFN
             + 2 * B * H * a_pad)        # answer head
    transcendentals = B * S + B * F + 4 * B * H
    bytes_accessed = (emb.size * 2 + amask3.size * 4 + last_mask.size * 4
                      + weight_bytes + B * a_pad * 4)

    cspec = functools.partial(_const_spec, single_buffer=single_buffer)

    return pl.pallas_call(
        mlm_answer_logits_kernel,
        out_shape=jax.ShapeDtypeStruct((B, a_pad), jnp.float32),
        grid_spec=pltpu.PrefetchScalarGridSpec(
            num_scalar_prefetch=0,
            grid=grid,
            in_specs=[
                pl.BlockSpec((bt, 1), lambda b: (b, 0)),        # last-mask positions
                pl.BlockSpec((bt, S, H), lambda b: (b, 0, 0)),  # embeddings
                pl.BlockSpec((bt, 1, S), lambda b: (b, 0, 0)),  # attention mask
                cspec((H, H)),                                  # Wq
                cspec((H, 2 * H)),                              # fused Wk|Wv
                cspec((H, H)),                                  # Wo
                cspec((H, F)), cspec((F, H)),                   # W1, W2
                cspec((4, H)),                                  # layernorm params
                cspec((H, a_pad)),                              # answer head
                cspec((1, a_pad)),                              # answer bias
            ],
            out_specs=pl.BlockSpec((bt, a_pad), lambda b: (b, 0)),
        ),
        compiler_params=pltpu.CompilerParams(
            dimension_semantics=("parallel",),   # batch tiles are independent
            vmem_limit_bytes=vmem_bytes),
        cost_estimate=pl.CostEstimate(flops=int(flops),
                                      transcendentals=int(transcendentals),
                                      bytes_accessed=int(bytes_accessed)),
    )(last_mask, emb, amask3, wq, wkv, wo, w1, w2, ln, head, hbias)


# ----------------------------------------------------------------------------
# Full forward pass (mirrors LMPrompt4Eval.forward)
# ----------------------------------------------------------------------------
@functools.partial(jax.jit, static_argnames=("mask_token_id",))
def lm_prompt4eval_forward(params, batch_enc, batch_attn, batch_labs,
                           answer_ids, mask_token_id):
    B, S = batch_enc.shape
    A = answer_ids.shape[0]
    a_pad = _round_up(A, LANE)

    # Glue: embedding lookup + mask bookkeeping (gathers stay in plain JAX).
    emb = jnp.take(params["emb"], batch_enc, axis=0)              # (B,S,H) bf16
    amask3 = batch_attn.astype(jnp.float32)[:, None, :]           # (B,1,S)

    # Last [MASK] position per row == the "[:, -1, :]" of the PyTorch .view().
    pos = jnp.where(batch_enc == mask_token_id,
                    jnp.arange(S, dtype=jnp.int32)[None, :], -1)
    last_mask = jnp.max(pos, axis=1, keepdims=True).astype(jnp.int32)  # (B,1)

    # Answer-column slice of the tied LM head, zero-padded lane-dense to 128.
    head = jnp.take(params["emb"], answer_ids, axis=0).T          # (H, A) bf16
    head = jnp.pad(head, ((0, 0), (0, a_pad - A)))
    hbias = jnp.take(params["bias"], answer_ids, axis=1)          # (1, A) f32
    hbias = jnp.pad(hbias, ((0, 0), (0, a_pad - A)))

    wkv = jnp.concatenate([params["wk"], params["wv"]], axis=1)   # (H, 2H)

    answer_logits = mlm_answer_logits(
        emb, amask3, last_mask, params["wq"], wkv, params["wo"],
        params["w1"], params["w2"], params["ln"], head, hbias)[:, :A]   # (B, A)

    # Eval head (CrossEntropyLoss + softmax) on a (B, A<=4) array: plain JAX,
    # a dedicated pallas_call here costs more than the math itself.
    labels = batch_labs.reshape(-1).astype(jnp.int32)             # (B,)
    logprobs = answer_logits - jax.nn.logsumexp(answer_logits, axis=-1,
                                                keepdims=True)
    nll = -jnp.take_along_axis(logprobs, labels[:, None], axis=1)[:, 0]
    loss = jnp.mean(nll)
    probs = jax.nn.softmax(answer_logits, axis=-1)
    return loss, probs


# ----------------------------------------------------------------------------
# Parameters, pure-JAX reference, smoke test
# ----------------------------------------------------------------------------
def make_params(key, vocab, hidden, ffn):
    # TODO(synk): no HuggingFace checkpoint load on TPU; synthetic weights stand
    # in for AutoModelForMaskedLM. At real scale, pick hidden/ffn as multiples
    # of 256 so MXU tiles on v6e/v7x are fully used.
    ks = jax.random.split(key, 8)
    scale = 0.05
    bf = lambda k, shp: (scale * jax.random.normal(k, shp, jnp.float32)
                         ).astype(jnp.bfloat16)
    ln = jnp.concatenate([
        jnp.ones((1, hidden), jnp.float32),   # gamma1
        jnp.zeros((1, hidden), jnp.float32),  # beta1
        jnp.ones((1, hidden), jnp.float32),   # gamma2
        jnp.zeros((1, hidden), jnp.float32),  # beta2
    ], axis=0)
    return {
        "emb": bf(ks[0], (vocab, hidden)),    # tied embedding / LM head
        "bias": scale * jax.random.normal(ks[1], (1, vocab), jnp.float32),
        "wq": bf(ks[2], (hidden, hidden)),
        "wk": bf(ks[3], (hidden, hidden)),
        "wv": bf(ks[4], (hidden, hidden)),
        "wo": bf(ks[5], (hidden, hidden)),
        "w1": bf(ks[6], (hidden, ffn)),
        "w2": bf(ks[7], (ffn, hidden)),
        "ln": ln,
    }


def reference_forward(params, batch_enc, batch_attn, batch_labs, answer_ids,
                      mask_token_id):
    """Pure-JAX f32 reference with the full-vocab head (original wiring)."""
    f32 = jnp.float32
    emb_tab = params["emb"].astype(f32)
    x = jnp.take(emb_tab, batch_enc, axis=0)                      # (B,S,H)
    B, S, H = x.shape
    amask = batch_attn.astype(f32)[:, None, :]
    wq, wk, wv, wo, w1, w2 = (params[n].astype(f32)
                              for n in ("wq", "wk", "wv", "wo", "w1", "w2"))
    ln = params["ln"]

    q, k, v = x @ wq, x @ wk, x @ wv
    scores = jnp.einsum("bqd,bkd->bqk", q, k) / jnp.sqrt(f32(H))
    scores = scores + (amask - 1.0) * 1e9
    p = jax.nn.softmax(scores, axis=-1)
    attn = jnp.einsum("bqk,bkd->bqd", p, v) @ wo

    def lnorm(h, g, b):
        mu = h.mean(-1, keepdims=True)
        var = ((h - mu) ** 2).mean(-1, keepdims=True)
        return (h - mu) * jax.lax.rsqrt(var + 1e-5) * g + b

    h1 = lnorm(x + attn, ln[0:1], ln[1:2])
    ff = jax.nn.gelu(h1 @ w1, approximate=True) @ w2
    h2 = lnorm(h1 + ff, ln[2:3], ln[3:4])
    logits = h2 @ emb_tab.T + params["bias"]                      # (B,S,V)

    pos = jnp.where(batch_enc == mask_token_id,
                    jnp.arange(S, dtype=jnp.int32)[None, :], -1)
    mask_logits = logits[jnp.arange(B), jnp.max(pos, axis=1)]     # (B,V)
    ans = mask_logits[:, answer_ids]                              # (B,A)

    labels = batch_labs.reshape(-1).astype(jnp.int32)
    logprobs = ans - jax.nn.logsumexp(ans, axis=-1, keepdims=True)
    nll = -jnp.take_along_axis(logprobs, labels[:, None], axis=1)[:, 0]
    return jnp.mean(nll), jax.nn.softmax(ans, axis=-1)


if __name__ == "__main__":
    B, S, H, V, F = 2, 8, 32, 128, 64
    MASK_TOKEN_ID = V - 1                                 # synthetic [MASK] id
    ANSWER_IDS = jnp.array([5, 17, 42, 99], dtype=jnp.int32)      # A = 4

    root = jax.random.PRNGKey(0)
    k_par, k_ids, k_lab = jax.random.split(root, 3)
    params = make_params(k_par, V, H, F)

    # Random tokens in [0, V-1) never collide with [MASK]; one [MASK] per row.
    batch_enc = jax.random.randint(k_ids, (B, S), 0, V - 1, dtype=jnp.int32)
    batch_enc = batch_enc.at[:, S - 2].set(MASK_TOKEN_ID)
    batch_attn = jnp.ones((B, S), dtype=jnp.int32)
    batch_attn = batch_attn.at[1, S - 1].set(0)           # a little padding
    batch_labs = jax.random.randint(k_lab, (B,), 0, ANSWER_IDS.shape[0],
                                    dtype=jnp.int32)

    loss, probs = lm_prompt4eval_forward(params, batch_enc, batch_attn,
                                         batch_labs, ANSWER_IDS, MASK_TOKEN_ID)
    loss = jax.block_until_ready(loss)
    probs = jax.block_until_ready(probs)

    ref_loss, ref_probs = reference_forward(params, batch_enc, batch_attn,
                                            batch_labs, ANSWER_IDS,
                                            MASK_TOKEN_ID)

    assert probs.shape == (B, int(ANSWER_IDS.shape[0]))
    assert bool(jnp.isfinite(loss)) and bool(jnp.all(jnp.isfinite(probs)))
    assert bool(jnp.allclose(jnp.sum(probs, axis=1), 1.0, atol=1e-5))
    # bf16 kernel vs f32 reference: loose tolerance for bf16 + approx-rcp.
    assert bool(jnp.allclose(probs, ref_probs, atol=5e-2))
    assert bool(jnp.allclose(loss, ref_loss, atol=5e-2))
    print("KERNEL_OK")
</pallas_src>

<mosaic_0001>
module attributes {stable_mosaic.version = 11 : i64} {
  func.func @mlm_answer_logits_kernel(%arg0: i32, %arg1: memref<2x1xi32, #tpu.memory_space<vmem>>, %arg2: memref<2x8x32xbf16, #tpu.memory_space<vmem>>, %arg3: memref<2x1x8xf32, #tpu.memory_space<vmem>>, %arg4: memref<32x32xbf16, #tpu.memory_space<vmem>>, %arg5: memref<32x64xbf16, #tpu.memory_space<vmem>>, %arg6: memref<32x32xbf16, #tpu.memory_space<vmem>>, %arg7: memref<32x64xbf16, #tpu.memory_space<vmem>>, %arg8: memref<64x32xbf16, #tpu.memory_space<vmem>>, %arg9: memref<4x32xf32, #tpu.memory_space<vmem>>, %arg10: memref<32x128xbf16, #tpu.memory_space<vmem>>, %arg11: memref<1x128xf32, #tpu.memory_space<vmem>>, %arg12: memref<2x128xf32, #tpu.memory_space<vmem>>) attributes {dimension_semantics = [#tpu.dimension_semantics<parallel>], iteration_bounds = array<i64: 1>, scalar_prefetch = 0 : i64, scratch_operands = 0 : i64, tpu.core_type = #tpu.core_type<tc>, window_params = [{transform_indices = @transform_0, window_bounds = array<i64: 2, 1>}, {transform_indices = @transform_1, window_bounds = array<i64: 2, 8, 32>}, {transform_indices = @transform_2, window_bounds = array<i64: 2, 1, 8>}, {pipeline_mode = #tpu.pipeline_mode<synchronous>, transform_indices = @transform_3, window_bounds = array<i64: 32, 32>}, {pipeline_mode = #tpu.pipeline_mode<synchronous>, transform_indices = @transform_4, window_bounds = array<i64: 32, 64>}, {pipeline_mode = #tpu.pipeline_mode<synchronous>, transform_indices = @transform_5, window_bounds = array<i64: 32, 32>}, {pipeline_mode = #tpu.pipeline_mode<synchronous>, transform_indices = @transform_6, window_bounds = array<i64: 32, 64>}, {pipeline_mode = #tpu.pipeline_mode<synchronous>, transform_indices = @transform_7, window_bounds = array<i64: 64, 32>}, {pipeline_mode = #tpu.pipeline_mode<synchronous>, transform_indices = @transform_8, window_bounds = array<i64: 4, 32>}, {pipeline_mode = #tpu.pipeline_mode<synchronous>, transform_indices = @transform_9, window_bounds = array<i64: 32, 128>}, {pipeline_mode = #tpu.pipeline_mode<synchronous>, transform_indices = @transform_10, window_bounds = array<i64: 1, 128>}, {transform_indices = @transform_11, window_bounds = array<i64: 2, 128>}]} {
    %c0 = arith.constant 0 : index
    %c0_0 = arith.constant 0 : index
    %c0_1 = arith.constant 0 : index
    %0 = vector.load %arg2[%c0, %c0_0, %c0_1] : memref<2x8x32xbf16, #tpu.memory_space<vmem>>, vector<2x8x32xbf16>
    %1 = vector.shape_cast %0 : vector<2x8x32xbf16> to vector<16x32xbf16>
    %c0_2 = arith.constant 0 : index
    %c0_3 = arith.constant 0 : index
    %2 = vector.load %arg5[%c0_2, %c0_3] : memref<32x64xbf16, #tpu.memory_space<vmem>>, vector<32x64xbf16>
    %cst = arith.constant dense<0.000000e+00> : vector<16x64xf32>
    %3 = tpu.matmul %1, %2, %cst {dimension_numbers = #tpu.dot_dimension_numbers<[1], [0], [0], [1], [0, 0, 1, 1], [], []>} : vector<16x32xbf16>, vector<32x64xbf16>, vector<16x64xf32> -> vector<16x64xf32>
    %4 = arith.truncf %3 : vector<16x64xf32> to vector<16x64xbf16>
    %5 = vector.extract_strided_slice %4 {offsets = [0, 0], sizes = [16, 32], strides = [1, 1]} : vector<16x64xbf16> to vector<16x32xbf16>
    %6 = vector.shape_cast %5 : vector<16x32xbf16> to vector<2x8x32xbf16>
    %7 = vector.extract_strided_slice %4 {offsets = [0, 32], sizes = [16, 32], strides = [1, 1]} : vector<16x64xbf16> to vector<16x32xbf16>
    %8 = vector.shape_cast %7 : vector<16x32xbf16> to vector<2x8x32xbf16>
    %c0_4 = arith.constant 0 : index
    %c0_5 = arith.constant 0 : index
    %9 = vector.load %arg1[%c0_4, %c0_5] : memref<2x1xi32, #tpu.memory_space<vmem>>, vector<2x1xi32>
    %10 = tpu.iota {dimensions = array<i32: 2>} : vector<2x1x8xi32>
    %11 = vector.shape_cast %9 : vector<2x1xi32> to vector<2x1x1xi32>
    %12 = vector.broadcast %11 : vector<2x1x1xi32> to vector<2x1x8xi32>
    %13 = arith.cmpi eq, %10, %12 : vector<2x1x8xi32>
    %14 = arith.extui %13 : vector<2x1x8xi1> to vector<2x1x8xi32>
    %15 = arith.sitofp %14 : vector<2x1x8xi32> to vector<2x1x8xf32>
    %16 = arith.truncf %15 : vector<2x1x8xf32> to vector<2x1x8xbf16>
    "tpu.trace_start"() <{level = 10 : i32, message = "bqs,bsh->bqh"}> : () -> ()
    %cst_6 = arith.constant dense<0.000000e+00> : vector<2x1x32xf32>
    %17 = tpu.matmul %16, %0, %cst_6 {dimension_numbers = #tpu.dot_dimension_numbers<[2], [1], [1], [2], [0, 0, 0, 1, 1, 2], [0], [0]>} : vector<2x1x8xbf16>, vector<2x8x32xbf16>, vector<2x1x32xf32> -> vector<2x1x32xf32>
    "tpu.trace_stop"() : () -> ()
    %18 = vector.shape_cast %17 : vector<2x1x32xf32> to vector<2x32xf32>
    %19 = arith.truncf %18 : vector<2x32xf32> to vector<2x32xbf16>
    %c0_7 = arith.constant 0 : index
    %c0_8 = arith.constant 0 : index
    %20 = vector.load %arg4[%c0_7, %c0_8] : memref<32x32xbf16, #tpu.memory_space<vmem>>, vector<32x32xbf16>
    %cst_9 = arith.constant dense<0.000000e+00> : vector<2x32xf32>
    %21 = tpu.matmul %19, %20, %cst_9 {dimension_numbers = #tpu.dot_dimension_numbers<[1], [0], [0], [1], [0, 0, 1, 1], [], []>} : vector<2x32xbf16>, vector<32x32xbf16>, vector<2x32xf32> -> vector<2x32xf32>
    %22 = arith.truncf %21 : vector<2x32xf32> to vector<2x32xbf16>
    %23 = vector.shape_cast %22 : vector<2x32xbf16> to vector<2x1x32xbf16>
    "tpu.trace_start"() <{level = 10 : i32, message = "bqd,bkd->bqk"}> : () -> ()
    %cst_10 = arith.constant dense<0.000000e+00> : vector<2x1x8xf32>
    %24 = tpu.matmul %23, %6, %cst_10 {dimension_numbers = #tpu.dot_dimension_numbers<[2], [2], [1], [1], [0, 0, 0, 1, 1, 1], [0], [0]>} : vector<2x1x32xbf16>, vector<2x8x32xbf16>, vector<2x1x8xf32> -> vector<2x1x8xf32>
    "tpu.trace_stop"() : () -> ()
    %cst_11 = arith.constant 0.176776692 : f32
    %25 = vector.broadcast %cst_11 : f32 to vector<2x1x8xf32>
    %26 = arith.mulf %24, %25 : vector<2x1x8xf32>
    %c0_12 = arith.constant 0 : index
    %c0_13 = arith.constant 0 : index
    %c0_14 = arith.constant 0 : index
    %27 = vector.load %arg3[%c0_12, %c0_13, %c0_14] : memref<2x1x8xf32, #tpu.memory_space<vmem>>, vector<2x1x8xf32>
    %cst_15 = arith.constant 1.000000e+00 : f32
    %28 = vector.broadcast %cst_15 : f32 to vector<2x1x8xf32>
    %29 = arith.subf %27, %28 : vector<2x1x8xf32>
    %cst_16 = arith.constant 1.000000e+09 : f32
    %30 = vector.broadcast %cst_16 : f32 to vector<2x1x8xf32>
    %31 = arith.mulf %29, %30 : vector<2x1x8xf32>
    %32 = arith.addf %26, %31 : vector<2x1x8xf32>
    %cst_17 = arith.constant dense<0xFF800000> : vector<2x1xf32>
    %33 = vector.multi_reduction <maximumf>, %32, %cst_17 [2] : vector<2x1x8xf32> to vector<2x1xf32>
    %34 = vector.shape_cast %33 : vector<2x1xf32> to vector<2x1x1xf32>
    %35 = vector.broadcast %34 : vector<2x1x1xf32> to vector<2x1x8xf32>
    %36 = arith.subf %32, %35 : vector<2x1x8xf32>
    %37 = math.exp %36 : vector<2x1x8xf32>
    %cst_18 = arith.constant dense<0.000000e+00> : vector<2x1xf32>
    %38 = vector.multi_reduction <add>, %37, %cst_18 [2] : vector<2x1x8xf32> to vector<2x1xf32>
    %39 = vector.shape_cast %38 : vector<2x1xf32> to vector<2x1x1xf32>
    %40 = tpu.reciprocal %39 {approx = true} : vector<2x1x1xf32> -> vector<2x1x1xf32>
    %41 = vector.broadcast %40 : vector<2x1x1xf32> to vector<2x1x8xf32>
    %42 = arith.mulf %37, %41 : vector<2x1x8xf32>
    %43 = arith.truncf %42 : vector<2x1x8xf32> to vector<2x1x8xbf16>
    "tpu.trace_start"() <{level = 10 : i32, message = "bqk,bkd->bqd"}> : () -> ()
    %cst_19 = arith.constant dense<0.000000e+00> : vector<2x1x32xf32>
    %44 = tpu.matmul %43, %8, %cst_19 {dimension_numbers = #tpu.dot_dimension_numbers<[2], [1], [1], [2], [0, 0, 0, 1, 1, 2], [0], [0]>} : vector<2x1x8xbf16>, vector<2x8x32xbf16>, vector<2x1x32xf32> -> vector<2x1x32xf32>
    "tpu.trace_stop"() : () -> ()
    %45 = vector.shape_cast %44 : vector<2x1x32xf32> to vector<2x32xf32>
    %46 = arith.truncf %45 : vector<2x32xf32> to vector<2x32xbf16>
    %c0_20 = arith.constant 0 : index
    %c0_21 = arith.constant 0 : index
    %47 = vector.load %arg6[%c0_20, %c0_21] : memref<32x32xbf16, #tpu.memory_space<vmem>>, vector<32x32xbf16>
    %cst_22 = arith.constant dense<0.000000e+00> : vector<2x32xf32>
    %48 = tpu.matmul %46, %47, %cst_22 {dimension_numbers = #tpu.dot_dimension_numbers<[1], [0], [0], [1], [0, 0, 1, 1], [], []>} : vector<2x32xbf16>, vector<32x32xbf16>, vector<2x32xf32> -> vector<2x32xf32>
    %c0_23 = arith.constant 0 : index
    %c0_24 = arith.constant 0 : index
    %49 = vector.load %arg9[%c0_23, %c0_24] : memref<4x32xf32, #tpu.memory_space<vmem>>, vector<4x32xf32>
    %50 = arith.addf %18, %48 : vector<2x32xf32>
    %51 = vector.extract_strided_slice %49 {offsets = [0, 0], sizes = [1, 32], strides = [1, 1]} : vector<4x32xf32> to vector<1x32xf32>
    %52 = vector.extract_strided_slice %49 {offsets = [1, 0], sizes = [1, 32], strides = [1, 1]} : vector<4x32xf32> to vector<1x32xf32>
    %cst_25 = arith.constant dense<0.000000e+00> : vector<2xf32>
    %53 = vector.multi_reduction <add>, %50, %cst_25 [1] : vector<2x32xf32> to vector<2xf32>
    %54 = vector.shape_cast %53 : vector<2xf32> to vector<2x1xf32>
    %cst_26 = arith.constant 3.200000e+01 : f32
    %55 = vector.broadcast %cst_26 : f32 to vector<2x1xf32>
    %56 = arith.divf %54, %55 : vector<2x1xf32>
    %57 = vector.broadcast %56 : vector<2x1xf32> to vector<2x32xf32>
    %58 = arith.subf %50, %57 : vector<2x32xf32>
    %59 = arith.mulf %58, %58 : vector<2x32xf32>
    %cst_27 = arith.constant dense<0.000000e+00> : vector<2xf32>
    %60 = vector.multi_reduction <add>, %59, %cst_27 [1] : vector<2x32xf32> to vector<2xf32>
    %61 = vector.shape_cast %60 : vector<2xf32> to vector<2x1xf32>
    %cst_28 = arith.constant 3.200000e+01 : f32
    %62 = vector.broadcast %cst_28 : f32 to vector<2x1xf32>
    %63 = arith.divf %61, %62 : vector<2x1xf32>
    %64 = vector.broadcast %56 : vector<2x1xf32> to vector<2x32xf32>
    %65 = arith.subf %50, %64 : vector<2x32xf32>
    %cst_29 = arith.constant 9.99999974E-6 : f32
    %66 = vector.broadcast %cst_29 : f32 to vector<2x1xf32>
    %67 = arith.addf %63, %66 : vector<2x1xf32>
    %68 = math.rsqrt %67 : vector<2x1xf32>
    %69 = vector.broadcast %68 : vector<2x1xf32> to vector<2x32xf32>
    %70 = arith.mulf %65, %69 : vector<2x32xf32>
    %71 = vector.broadcast %51 : vector<1x32xf32> to vector<2x32xf32>
    %72 = arith.mulf %70, %71 : vector<2x32xf32>
    %73 = vector.broadcast %52 : vector<1x32xf32> to vector<2x32xf32>
    %74 = arith.addf %72, %73 : vector<2x32xf32>
    %75 = arith.truncf %74 : vector<2x32xf32> to vector<2x32xbf16>
    %c0_30 = arith.constant 0 : index
    %c0_31 = arith.constant 0 : index
    %76 = vector.load %arg7[%c0_30, %c0_31] : memref<32x64xbf16, #tpu.memory_space<vmem>>, vector<32x64xbf16>
    %cst_32 = arith.constant dense<0.000000e+00> : vector<2x64xf32>
    %77 = tpu.matmul %75, %76, %cst_32 {dimension_numbers = #tpu.dot_dimension_numbers<[1], [0], [0], [1], [0, 0, 1, 1], [], []>} : vector<2x32xbf16>, vector<32x64xbf16>, vector<2x64xf32> -> vector<2x64xf32>
    %78 = arith.mulf %77, %77 : vector<2x64xf32>
    %79 = arith.mulf %77, %78 : vector<2x64xf32>
    %cst_33 = arith.constant 4.471500e-02 : f32
    %80 = vector.broadcast %cst_33 : f32 to vector<2x64xf32>
    %81 = arith.mulf %80, %79 : vector<2x64xf32>
    %82 = arith.addf %77, %81 : vector<2x64xf32>
    %cst_34 = arith.constant 0.797884583 : f32
    %83 = vector.broadcast %cst_34 : f32 to vector<2x64xf32>
    %84 = arith.mulf %83, %82 : vector<2x64xf32>
    %85 = math.tanh %84 : vector<2x64xf32>
    %cst_35 = arith.constant 1.000000e+00 : f32
    %86 = vector.broadcast %cst_35 : f32 to vector<2x64xf32>
    %87 = arith.addf %86, %85 : vector<2x64xf32>
    %cst_36 = arith.constant 5.000000e-01 : f32
    %88 = vector.broadcast %cst_36 : f32 to vector<2x64xf32>
    %89 = arith.mulf %88, %87 : vector<2x64xf32>
    %90 = arith.mulf %77, %89 : vector<2x64xf32>
    %91 = arith.truncf %90 : vector<2x64xf32> to vector<2x64xbf16>
    %c0_37 = arith.constant 0 : index
    %c0_38 = arith.constant 0 : index
    %92 = vector.load %arg8[%c0_37, %c0_38] : memref<64x32xbf16, #tpu.memory_space<vmem>>, vector<64x32xbf16>
    %cst_39 = arith.constant dense<0.000000e+00> : vector<2x32xf32>
    %93 = tpu.matmul %91, %92, %cst_39 {dimension_numbers = #tpu.dot_dimension_numbers<[1], [0], [0], [1], [0, 0, 1, 1], [], []>} : vector<2x64xbf16>, vector<64x32xbf16>, vector<2x32xf32> -> vector<2x32xf32>
    %94 = arith.addf %74, %93 : vector<2x32xf32>
    %95 = vector.extract_strided_slice %49 {offsets = [2, 0], sizes = [1, 32], strides = [1, 1]} : vector<4x32xf32> to vector<1x32xf32>
    %96 = vector.extract_strided_slice %49 {offsets = [3, 0], sizes = [1, 32], strides = [1, 1]} : vector<4x32xf32> to vector<1x32xf32>
    %cst_40 = arith.constant dense<0.000000e+00> : vector<2xf32>
    %97 = vector.multi_reduction <add>, %94, %cst_40 [1] : vector<2x32xf32> to vector<2xf32>
    %98 = vector.shape_cast %97 : vector<2xf32> to vector<2x1xf32>
    %cst_41 = arith.constant 3.200000e+01 : f32
    %99 = vector.broadcast %cst_41 : f32 to vector<2x1xf32>
    %100 = arith.divf %98, %99 : vector<2x1xf32>
    %101 = vector.broadcast %100 : vector<2x1xf32> to vector<2x32xf32>
    %102 = arith.subf %94, %101 : vector<2x32xf32>
    %103 = arith.mulf %102, %102 : vector<2x32xf32>
    %cst_42 = arith.constant dense<0.000000e+00> : vector<2xf32>
    %104 = vector.multi_reduction <add>, %103, %cst_42 [1] : vector<2x32xf32> to vector<2xf32>
    %105 = vector.shape_cast %104 : vector<2xf32> to vector<2x1xf32>
    %cst_43 = arith.constant 3.200000e+01 : f32
    %106 = vector.broadcast %cst_43 : f32 to vector<2x1xf32>
    %107 = arith.divf %105, %106 : vector<2x1xf32>
    %108 = vector.broadcast %100 : vector<2x1xf32> to vector<2x32xf32>
    %109 = arith.subf %94, %108 : vector<2x32xf32>
    %cst_44 = arith.constant 9.99999974E-6 : f32
    %110 = vector.broadcast %cst_44 : f32 to vector<2x1xf32>
    %111 = arith.addf %107, %110 : vector<2x1xf32>
    %112 = math.rsqrt %111 : vector<2x1xf32>
    %113 = vector.broadcast %112 : vector<2x1xf32> to vector<2x32xf32>
    %114 = arith.mulf %109, %113 : vector<2x32xf32>
    %115 = vector.broadcast %95 : vector<1x32xf32> to vector<2x32xf32>
    %116 = arith.mulf %114, %115 : vector<2x32xf32>
    %117 = vector.broadcast %96 : vector<1x32xf32> to vector<2x32xf32>
    %118 = arith.addf %116, %117 : vector<2x32xf32>
    %119 = arith.truncf %118 : vector<2x32xf32> to vector<2x32xbf16>
    %c0_45 = arith.constant 0 : index
    %c0_46 = arith.constant 0 : index
    %120 = vector.load %arg10[%c0_45, %c0_46] : memref<32x128xbf16, #tpu.memory_space<vmem>>, vector<32x128xbf16>
    %cst_47 = arith.constant dense<0.000000e+00> : vector<2x128xf32>
    %121 = tpu.matmul %119, %120, %cst_47 {dimension_numbers = #tpu.dot_dimension_numbers<[1], [0], [0], [1], [0, 0, 1, 1], [], []>} : vector<2x32xbf16>, vector<32x128xbf16>, vector<2x128xf32> -> vector<2x128xf32>
    %c0_48 = arith.constant 0 : index
    %c0_49 = arith.constant 0 : index
    %122 = vector.load %arg11[%c0_48, %c0_49] : memref<1x128xf32, #tpu.memory_space<vmem>>, vector<1x128xf32>
    %123 = vector.broadcast %122 : vector<1x128xf32> to vector<2x128xf32>
    %124 = arith.addf %121, %123 : vector<2x128xf32>
    %c0_50 = arith.constant 0 : index
    %c0_51 = arith.constant 0 : index
    %125 = vector.load %arg12[%c0_50, %c0_51] : memref<2x128xf32, #tpu.memory_space<vmem>>, vector<2x128xf32>
    tpu.vector_store %arg12[%c0_50, %c0_51], %124 {strides = array<i32>} : memref<2x128xf32, #tpu.memory_space<vmem>>, vector<2x128xf32>,
    return
  }
  func.func @transform_0(%arg0: i32) -> (i32, i32) {
    %c0_i32 = arith.constant 0 : i32
    %c0_i32_0 = arith.constant 0 : i32
    return %arg0, %c0_i32 : i32, i32
  }
  func.func @transform_1(%arg0: i32) -> (i32, i32, i32) {
    %c0_i32 = arith.constant 0 : i32
    %c0_i32_0 = arith.constant 0 : i32
    %c0_i32_1 = arith.constant 0 : i32
    return %arg0, %c0_i32, %c0_i32_0 : i32, i32, i32
  }
  func.func @transform_2(%arg0: i32) -> (i32, i32, i32) {
    %c0_i32 = arith.constant 0 : i32
    %c0_i32_0 = arith.constant 0 : i32
    %c0_i32_1 = arith.constant 0 : i32
    return %arg0, %c0_i32, %c0_i32_0 : i32, i32, i32
  }
  func.func @transform_3(%arg0: i32) -> (i32, i32) {
    %c0_i32 = arith.constant 0 : i32
    %c0_i32_0 = arith.constant 0 : i32
    %c0_i32_1 = arith.constant 0 : i32
    return %c0_i32, %c0_i32_0 : i32, i32
  }
  func.func @transform_4(%arg0: i32) -> (i32, i32) {
    %c0_i32 = arith.constant 0 : i32
    %c0_i32_0 = arith.constant 0 : i32
    %c0_i32_1 = arith.constant 0 : i32
    return %c0_i32, %c0_i32_0 : i32, i32
  }
  func.func @transform_5(%arg0: i32) -> (i32, i32) {
    %c0_i32 = arith.constant 0 : i32
    %c0_i32_0 = arith.constant 0 : i32
    %c0_i32_1 = arith.constant 0 : i32
    return %c0_i32, %c0_i32_0 : i32, i32
  }
  func.func @transform_6(%arg0: i32) -> (i32, i32) {
    %c0_i32 = arith.constant 0 : i32
    %c0_i32_0 = arith.constant 0 : i32
    %c0_i32_1 = arith.constant 0 : i32
    return %c0_i32, %c0_i32_0 : i32, i32
  }
  func.func @transform_7(%arg0: i32) -> (i32, i32) {
    %c0_i32 = arith.constant 0 : i32
    %c0_i32_0 = arith.constant 0 : i32
    %c0_i32_1 = arith.constant 0 : i32
    return %c0_i32, %c0_i32_0 : i32, i32
  }
  func.func @transform_8(%arg0: i32) -> (i32, i32) {
    %c0_i32 = arith.constant 0 : i32
    %c0_i32_0 = arith.constant 0 : i32
    %c0_i32_1 = arith.constant 0 : i32
    return %c0_i32, %c0_i32_0 : i32, i32
  }
  func.func @transform_9(%arg0: i32) -> (i32, i32) {
    %c0_i32 = arith.constant 0 : i32
    %c0_i32_0 = arith.constant 0 : i32
    %c0_i32_1 = arith.constant 0 : i32
    return %c0_i32, %c0_i32_0 : i32, i32
  }
  func.func @transform_10(%arg0: i32) -> (i32, i32) {
    %c0_i32 = arith.constant 0 : i32
    %c0_i32_0 = arith.constant 0 : i32
    %c0_i32_1 = arith.constant 0 : i32
    return %c0_i32, %c0_i32_0 : i32, i32
  }
  func.func @transform_11(%arg0: i32) -> (i32, i32) {
    %c0_i32 = arith.constant 0 : i32
    %c0_i32_0 = arith.constant 0 : i32
    return %arg0, %c0_i32 : i32, i32
  }
}

</mosaic_0001>

<bundles_post_ra>
// kernel: lm_prompt4eval_forward.1
= control target key start
LH: loop header
LB: loop body
LE: loop exit
PB: predicated region body
PF: predicated region fallthrough
CT: control target
= control target key end

     0   :  { %v114_v0 = vlaneseq  ;;  %v1176_v1 = vmov 0   ;;  %v1177_v2 = vmov 1966171168   ;;  %v1178_v4 = vmov 0.0   ;;  %s1426_s0 = inlined_call_operand.vmem [shape: s32[2,1], index: 0, kind: input, shape index: {}]   ;;  %s1427_s1 = inlined_call_operand.vmem [shape: bf16[2,8,32], index: 1, kind: input, shape index: {}]   ;;  %s1428_s4 = inlined_call_operand.vmem [shape: bf16[32,64], index: 4, kind: input, shape index: {}]   ;;  %s1429_s3 = inlined_call_operand.vmem [shape: bf16[32,32], index: 3, kind: input, shape index: {}]   ;;  %s1430_s2 = inlined_call_operand.vmem [shape: f32[2,1,8], index: 2, kind: input, shape index: {}]   ;;  %s1431_s5 = inlined_call_operand.vmem [shape: bf16[32,32], index: 5, kind: input, shape index: {}]   ;;  %s1432_s6 = inlined_call_operand.vmem [shape: bf16[32,64], index: 6, kind: input, shape index: {}]   ;;  %s1433_s8 = inlined_call_operand.vmem [shape: f32[4,32], index: 8, kind: input, shape index: {}]   ;;  %s1434_s7 = inlined_call_operand.vmem [shape: bf16[64,32], index: 7, kind: input, shape index: {}]   ;;  %s1435_s9 = inlined_call_operand.vmem [shape: bf16[32,128], index: 9, kind: input, shape index: {}]   ;;  %s1436_s10 = inlined_call_operand.vmem [shape: f32[1,128], index: 10, kind: input, shape index: {}]   ;;  %s1437_s11 = inlined_call_operand.vmem [shape: f32[2,128], index: 11, kind: output, shape index: {}]  }
   0x1   :  { %1146 = vset.pattern.permute.xlu0 %v1176_v1  ;;  %v125_v3 = vunpack.c.l.s4 %v1177_v2  ;;  %1061 = vmatprep.subr.bf16.mxu1 %v1178_v4  ;;  %v989_v7 = vld.sshfl [vmem:[%s1426_s0] sm:$0x11 pattern:$0x75316420]  ;;  %vm164_vm0 = vcmask 1043456   ;;  %vm1179_vm1 = vmmov 0  }
   0x2   :  { %v1242_v5 = vshrl.u32 %v114_v0, 7  ;;  %1053 = vmatprep.subr.bf16.mxu0 %v1178_v4  ;;  %v123_v9 = vcombine.high %v989_v7, %v989_v7  ;;  %v39_v10 = vld [vmem:[%s1427_s1] sm:$0xf]  ;;  %v40_v14 = vld [vmem:[%s1427_s1 + $0x4] sm:$0xf]  ;;  %1063 = vmatprep.mubr.msk.bf16.mxu1 %vm1179_vm1, %v1178_v4  ;;  %v1148_v16 = vld [vmem:[%s1428_s4 + $0x8] sm:$0xff]  }
   0x3   :  { %v126_v6 = vunpack.c.0.s8 %v125_v3  ;;  %v166_v12 = vsel %vm164_vm0, %v39_v10, 0  ;;  %v983_v15 = vcombine.low %v39_v10, %v40_v14  ;;  %1057 = vmatprep.mubr.msk.bf16.mxu0 %vm1179_vm1, %v1178_v4  ;;  %1054 = vmatpush3.bf16.msra.mxu0 %v1148_v16  ;;  %v115_v18 = vand.u32 127, %v114_v0  ;;  %v1149_v28 = vld [vmem:[%s1428_s4] sm:$0xff]   ;;  %v1150_v29 = vld [vmem:[%s1429_s3 + $0x8] sm:$0xff]  }
   0x4   :  { %1062 = vmatpush3.bf16.msra.mxu1 %v166_v12  ;;  %1055 = vmatprep.subr.bf16.mxu0 %v1178_v4  ;;  %v1270_v17 = vsub.s32 0, %v1242_v5  ;;  %vm160_vm3 = vcmask 64512   ;;  %v212_v25 = vsel %vm164_vm0, %v40_v14, 0  ;;  %vm62_vm5 = vcmask 261120   ;;  %v1151_v30 = vld [vmem:[%s1429_s3] sm:$0xff]  }
   0x5   :  { %v1249_v8 = vsub.s32 %v126_v6, %v1242_v5  ;;  %1067 = vmatprep.subr.bf16.mxu1 %v1178_v4  ;;  %vm265_vm6 = vcmask 1041409   ;;  %v446_v2 = vld [vmem:[%s1430_s2 + $0x1] sm:$0x1]  ;;  %v445_v3 = vld [vmem:[%s1430_s2] sm:$0x1]  ;;  %vm453_vm7 = vcmask 57344  }
   0x6   :  { %v1001_v6 = vadd.f32 -1.0, %v446_v2  ;;  %s1180_s2 = smov 96   ;;  %vm654_vm8 = vcmask 254976   ;;  %vm807_vm9 = vcmask 523264  }
   0x7   :  { %v130_v11 = vrot.slane %v989_v7, %v1249_v8  ;;  %v137_v13 = vrot.slane %v123_v9, %v1249_v8  ;;  %1056 = vmatpush3.bf16.msra.mxu0 %v1149_v28  ;;  %v1000_v7 = vadd.f32 -1.0, %v445_v3 }
   0x8   :  { %1073 = vmatprep.subr.bf16.mxu0 %v1178_v4  ;;  %v450_v9 = vmul.f32 1e+09, %v1001_v6 }
   0x9   :  { %139 = vperm.xlu0 %1146, %v130_v11   ;;  %v449_v14 = vmul.f32 1e+09, %v1000_v7 }
   0xa   :  { %1058 = vmatmul.mubr.msk.bf16.vlgmr.msra.gmra.mxu0 %vm62_vm5, %v983_v15 }
   0xb   :  { %1077 = vmatprep.mubr.msk.bf16.mxu0 %vm1179_vm1, %v1178_v4  ;;  %1074 = vmatpush3.bf16.msra.mxu0 %v1150_v29 }
   0xc   :  { %1075 = vmatprep.subr.bf16.mxu0 %v1178_v4 }
   0xd   :  { %146 = vperm.xlu0 %1146, %v137_v13  }
   0xf   :  { %1076 = vmatpush3.bf16.msra.mxu0 %v1151_v30 }
  0x10   :  { %1087 = vmatprep.subr.bf16.mxu0 %v1178_v4 }
  0x84   :  { %v140_v19 = vpop.permute.xlu0 %139 }
  0x85   :  { %v144_v20 = vrot.slane %v140_v19, %v1270_v17 }
  0x87   :  { %vm152_vm2 = vcmp.eq.s32.totalorder %v115_v18, %v144_v20 }
  0x88   :  { %v990_v21 = vsel %vm152_vm2, 1.0, %v1178_v4  ;;  %v147_v22 = vpop.permute.xlu0 %146 }
  0x89   :  { %v158_v23 = vpack.c.bf16 %v990_v21, %v990_v21  ;;  %v151_v24 = vrot.slane %v147_v22, %v1270_v17 }
  0x8b   :  { %vm153_vm4 = vcmp.eq.s32.totalorder %v115_v18, %v151_v24  ;;  %1064 = vmatmul.mubr.msk.bf16.vlgmr.msra.gmra.mxu1 %vm160_vm3, %v158_v23 }
  0x8c   :  { %1068 = vmatpush3.bf16.msra.mxu1 %v212_v25  ;;  %1069 = vmatprep.mubr.msk.bf16.mxu1 %vm1179_vm1, %v1178_v4  ;;  %v991_v26 = vsel %vm153_vm4, 1.0, %v1178_v4 }
  0x8d   :  { %1081 = vmatprep.subr.bf16.mxu1 %v1178_v4  ;;  %v159_v27 = vpack.c.bf16 %v991_v26, %v991_v26 }
  0x93   :  { %1070 = vmatmul.mubr.msk.bf16.vlgmr.msra.gmra.mxu1 %vm160_vm3, %v159_v27 }
  0x94   :  { %1083 = vmatprep.mubr.msk.bf16.mxu1 %vm1179_vm1, %v1178_v4 }
  0xca   :  { %v100_v46 = vpop.f32.mrf.mxu0 }
  0xcb   :  { %v1311_v47 = vpack.c.bf16 %v100_v46, %v100_v46 }
  0xcc   :  { %v1059_v48 = vpop.f32.mrf.mxu0 }
  0xcd   :  { %v350_v49 = vsel %vm62_vm5, %v1311_v47, 0 }
  0xce   :  { %v103_v50 = vpop.f32.mrf.mxu0  ;;  %1082 = vmatpush3.bf16.xpose.msra.mxu1 %v350_v49  ;;  %v1152_v49 = vld [vmem:[%s1431_s5 + $0x8] sm:$0xff]  }
  0xcf   :  { %v1020_v51 = vpack.c.bf16 %v103_v50, %v103_v50  ;;  %1093 = vmatprep.subr.bf16.mxu1 %v1178_v4  ;;  %v1153_v50 = vld [vmem:[%s1431_s5] sm:$0xff]  }
  0xd0   :  { %v1060_v52 = vpop.f32.mrf.mxu0 }
  0xd1   :  { %v401_v53 = vsel %vm62_vm5, %v1020_v51, 0 }
 0x14b   :  { %v1299_v31 = vpop.f32.mrf.mxu1 }
 0x14c   :  { %v254_v36 = vpack.c.bf16 %v1299_v31, %v1299_v31 }
 0x14d   :  { %v1065_v32 = vpop.f32.mrf.mxu1 }
 0x14e   :  { %v262_v41 = vunpack.c.l.b16 %v254_v36 }
 0x14f   :  { %v205_v33 = vpop.f32.mrf.mxu1 }
 0x151   :  { %v1066_v34 = vpop.f32.mrf.mxu1 }
 0x153   :  { %v1301_v35 = vpop.f32.mrf.mxu1 }
 0x154   :  { %v255_v37 = vpack.c.bf16 %v1301_v35, %v1301_v35 }
 0x155   :  { %v1071_v38 = vpop.f32.mrf.mxu1 }
 0x156   :  { %v263_v39 = vunpack.c.l.b16 %v255_v37 }
 0x157   :  { %v251_v40 = vpop.f32.mrf.mxu1 }
 0x158   :  { %v264_v42 = vrot.slane %v263_v39, 7 }
 0x159   :  { %v1072_v43 = vpop.f32.mrf.mxu1 }
 0x15a   :  { %v266_v44 = vsel %vm265_vm6, %v264_v42, %v262_v41 }
 0x15b   :  { %v267_v45 = vpack.c.b16 %v266_v44, %v266_v44 }
 0x15d   :  { %1078 = vmatmul.mubr.msk.bf16.vlgmr.msra.gmra.mxu0 %vm62_vm5, %v267_v45 }
 0x15e   :  { %1089 = vmatprep.mubr.msk.bf16.mxu0 %vm1179_vm1, %v1178_v4  ;;  %1088 = vmatpush3.bf16.xpose.msra.mxu0 %v401_v53 }
 0x15f   :  { %1099 = vmatprep.subr.bf16.mxu0 %v1178_v4 }
 0x21d   :  { %v317_v54 = vpop.f32.mrf.mxu0 }
 0x21e   :  { %v323_v55 = vpack.c.bf16 %v317_v54, %v317_v54 }
 0x21f   :  { %v1079_v56 = vpop.f32.mrf.mxu0 }
 0x220   :  { %v331_v57 = vrot.slane %v323_v55, %v1249_v8 }
 0x221   :  { %v320_v58 = vpop.f32.mrf.mxu0 }
 0x222   :  { %v338_v59 = vrot.slane %v331_v57, %v1249_v8 }
 0x223   :  { %v1080_v60 = vpop.f32.mrf.mxu0 }
 0x224   :  { %v340_v61 = vunpack.i.h.s16 %v338_v59  ;;  %v997_v62 = vpack.i.b16 %v338_v59, %v338_v59 }
 0x226   :  { %v345_v63 = vrot.slane %v997_v62, %v1270_v17  ;;  %v392_v0 = vpack.i.b16 %v340_v61, %v340_v61 }
 0x228   :  { %v396_v1 = vrot.slane %v392_v0, %v1270_v17  ;;  %1084 = vmatmul.mubr.msk.bf16.vlgmr.msra.gmra.mxu1 %vm62_vm5, %v345_v63 }
 0x229   :  { %1095 = vmatprep.mubr.msk.bf16.mxu1 %vm1179_vm1, %v1178_v4 }
 0x22a   :  { %1090 = vmatmul.mubr.msk.bf16.vlgmr.msra.gmra.mxu0 %vm62_vm5, %v396_v1 }
 0x22b   :  { %1101 = vmatprep.mubr.msk.bf16.mxu0 %vm1179_vm1, %v1178_v4 }
 0x2e8   :  { %v386_v8 = vpop.f32.mrf.mxu1 }
 0x2e9   :  { %v443_v12 = vmul.f32 0.17677669, %v386_v8 }
 0x2ea   :  { %v1085_v10 = vpop.f32.mrf.mxu1  ;;  %v437_v11 = vpop.f32.mrf.mxu0 }
 0x2eb   :  { %v444_v13 = vmul.f32 0.17677669, %v437_v11  ;;  %v451_v22 = vadd.f32 %v449_v14, %v443_v12 }
 0x2ec   :  { %v389_v15 = vpop.f32.mrf.mxu1  ;;  %v1091_v16 = vpop.f32.mrf.mxu0 }
 0x2ed   :  { %v452_v18 = vadd.f32 %v450_v9, %v444_v13  ;;  %v454_v24 = vsel %vm453_vm7, %v451_v22, -inf }
 0x2ee   :  { %v1086_v19 = vpop.f32.mrf.mxu1  ;;  %v440_v20 = vpop.f32.mrf.mxu0 }
 0x2ef   :  { %v457_v21 = vsel %vm453_vm7, %v452_v18, -inf }
 0x2f0   :  { %458 = vmax.xlane.f32.xlu1 %v457_v21  ;;  %v1092_v23 = vpop.f32.mrf.mxu0 }
 0x2f1   :  { %v1154_v23 = vld [vmem:[%s1432_s6 + $0x8] sm:$0xff]  }
 0x2f4   :  { %455 = vmax.xlane.f32.xlu1 %v454_v24  ;;  %v1155_v24 = vld [vmem:[%s1432_s6] sm:$0xff]  }
 0x379   :  { %v459_v25 = vpop.xlane.xlu1 %458 }
 0x37a   :  { %v461_v26 = vsub.f32 %v452_v18, %v459_v25 }
 0x37c   :  { %v464_v27 = vmul.f32 1.442695, %v461_v26 }
 0x37d   :  { %v456_v28 = vpop.xlane.xlu1 %455 }
 0x37e   :  { %1162 = vpow2.f32 %v464_v27  ;;  %v460_v29 = vsub.f32 %v451_v22, %v456_v28  ;;  %v1378_v28 = vld [vmem:[%s1433_s8] sm:$0xf] }
 0x380   :  { %v462_v30 = vmul.f32 1.442695, %v460_v29  ;;  %v693_v29 = vsub.s32 1, %v1242_v5 }
 0x382   :  { %1164 = vpow2.f32 %v462_v30  ;;  %v688_v30 = vrot.slane %v1378_v28, %v1270_v17  ;;  %v1156_v17 = vld [vmem:[%s1434_s7 + $0x18] sm:$0xff]  }
 0x38b   :  { %v1163_v32 = vpop.eup %1162 }
 0x38c   :  { %v469_v33 = vsel %vm453_vm7, %v1163_v32, 0.0 }
 0x38d   :  { %470 = vadd.xlane.f32.xlu0 %v469_v33 }
 0x38f   :  { %v1165_v34 = vpop.eup %1164 }
 0x390   :  { %v466_v36 = vsel %vm453_vm7, %v1165_v34, 0.0 }
 0x391   :  { %467 = vadd.xlane.f32.xlu1 %v466_v36  ;;  %v694_v36 = vrot.slane %v1378_v28, %v693_v29  ;;  %v893_v29 = vsub.s32 2, %v1242_v5 }
 0x3a2   :  { %526 = vrot.lane.b32.xlu1 %v1020_v51, %s1180_s2 }
 0x3a6   :  { %478 = vrot.lane.b32.xlu1 %v1311_v47, %s1180_s2 }
 0x416   :  { %v471_v37 = vpop.xlane.xlu0 %470 }
 0x417   :  { %1166 = vrcp.f32 %v471_v37 }
 0x41a   :  { %v468_v38 = vpop.xlane.xlu1 %467 }
 0x41b   :  { %1168 = vrcp.f32 %v468_v38 }
 0x41e   :  { %v527_v39 = vpop.permute.xlu1 %526 }
 0x41f   :  { %v532_v40 = vsel %vm164_vm0, %v527_v39, 0 }
 0x420   :  { %1100 = vmatpush3.bf16.msra.mxu0 %v532_v40 }
 0x421   :  { %1113 = vmatprep.subr.bf16.mxu0 %v1178_v4 }
 0x422   :  { %v479_v41 = vpop.permute.xlu1 %478 }
 0x423   :  { %v484_v42 = vsel %vm164_vm0, %v479_v41, 0 }
 0x424   :  { %v1167_v43 = vpop.eup %1166  ;;  %1094 = vmatpush3.bf16.msra.mxu1 %v484_v42 }
 0x425   :  { %v475_v44 = vmul.f32 %v1167_v43, %v1163_v32  ;;  %1105 = vmatprep.subr.bf16.mxu1 %v1178_v4 }
 0x427   :  { %v477_v45 = vpack.c.bf16 %v475_v44, %v475_v44 }
 0x428   :  { %v1169_v46 = vpop.eup %1168 }
 0x429   :  { %1102 = vmatmul.mubr.msk.bf16.vlgmr.msra.gmra.mxu0 %vm160_vm3, %v477_v45  ;;  %v474_v47 = vmul.f32 %v1169_v46, %v1165_v34 }
 0x42a   :  { %1117 = vmatprep.mubr.msk.bf16.mxu0 %vm1179_vm1, %v1178_v4  ;;  %1114 = vmatpush3.bf16.msra.mxu0 %v1154_v23  ;;  %v1160_v23 = vld [vmem:[%s1435_s9 + $0x8] sm:$0xff]  }
 0x42b   :  { %v476_v48 = vpack.c.bf16 %v474_v47, %v474_v47  ;;  %1115 = vmatprep.subr.bf16.mxu0 %v1178_v4 }
 0x42d   :  { %1096 = vmatmul.mubr.msk.bf16.vlgmr.msra.gmra.mxu1 %vm160_vm3, %v476_v48 }
 0x42e   :  { %1109 = vmatprep.mubr.msk.bf16.mxu1 %vm1179_vm1, %v1178_v4  ;;  %1106 = vmatpush3.bf16.msra.mxu1 %v1152_v49  ;;  %v1157_v49 = vld [vmem:[%s1434_s7 + $0x10] sm:$0xff]  }
 0x42f   :  { %1107 = vmatprep.subr.bf16.mxu1 %v1178_v4  ;;  %1116 = vmatpush3.bf16.msra.mxu0 %v1155_v24  ;;  %v1161_v24 = vld [vmem:[%s1435_s9] sm:$0xff]  }
 0x430   :  { %1133 = vmatprep.subr.bf16.mxu0 %v1178_v4 }
 0x432   :  { %1108 = vmatpush3.bf16.msra.mxu1 %v1153_v50  ;;  %v1158_v50 = vld [vmem:[%s1434_s7 + $0x8] sm:$0xff]  }
 0x433   :  { %1121 = vmatprep.subr.bf16.mxu1 %v1178_v4 }
 0x4e9   :  { %v568_v51 = vpop.f32.mrf.mxu0 }
 0x4ea   :  { %v575_v52 = vpack.c.bf16 %v568_v51, %v568_v51  ;;  %v1159_v51 = vld [vmem:[%s1434_s7] sm:$0xff]  }
 0x4eb   :  { %v1103_v53 = vpop.f32.mrf.mxu0 }
 0x4ec   :  { %v583_v54 = vunpack.c.l.b16 %v575_v52 }
 0x4ed   :  { %v520_v55 = vpop.f32.mrf.mxu1  ;;  %v571_v56 = vpop.f32.mrf.mxu0 }
 0x4ee   :  { %v574_v57 = vpack.c.bf16 %v520_v55, %v520_v55  ;;  %v584_v60 = vrot.slane %v583_v54, 7 }
 0x4ef   :  { %v1097_v58 = vpop.f32.mrf.mxu1  ;;  %v1104_v59 = vpop.f32.mrf.mxu0 }
 0x4f0   :  { %v582_v61 = vunpack.c.l.b16 %v574_v57 }
 0x4f1   :  { %v523_v62 = vpop.f32.mrf.mxu1 }
 0x4f2   :  { %v585_v63 = vsel %vm265_vm6, %v584_v60, %v582_v61 }
 0x4f3   :  { %v586_v0 = vpack.c.b16 %v585_v63, %v585_v63  ;;  %v1098_v1 = vpop.f32.mrf.mxu1 }
 0x4f5   :  { %1110 = vmatmul.mubr.msk.bf16.vlgmr.msra.gmra.mxu1 %vm62_vm5, %v586_v0 }
 0x4f6   :  { %1129 = vmatprep.mubr.msk.bf16.mxu1 %vm1179_vm1, %v1178_v4  ;;  %1122 = vmatpush3.bf16.msra.mxu1 %v1156_v17 }
 0x4f7   :  { %1123 = vmatprep.subr.bf16.mxu1 %v1178_v4 }
 0x4fa   :  { %1124 = vmatpush3.bf16.msra.mxu1 %v1157_v49 }
 0x4fb   :  { %1125 = vmatprep.subr.bf16.mxu1 %v1178_v4 }
 0x4fe   :  { %1126 = vmatpush3.bf16.msra.mxu1 %v1158_v50 }
 0x4ff   :  { %1127 = vmatprep.subr.bf16.mxu1 %v1178_v4 }
 0x502   :  { %1128 = vmatpush3.bf16.msra.mxu1 %v1159_v51 }
 0x5b5   :  { %v636_v2 = vpop.f32.mrf.mxu1 }
 0x5b6   :  { %v644_v3 = vrot.slane %v636_v2, 1  ;;  %v647_v9 = vadd.f32 %v636_v2, %v1299_v31 }
 0x5b7   :  { %v1111_v6 = vpop.f32.mrf.mxu1 }
 0x5b8   :  { %v648_v7 = vadd.f32 %v644_v3, %v1301_v35 }
 0x5b9   :  { %v639_v8 = vpop.f32.mrf.mxu1 }
 0x5ba   :  { %v651_v10 = vrot.slane %v648_v7, 7 }
 0x5bb   :  { %v1112_v11 = vpop.f32.mrf.mxu1 }
 0x5bc   :  { %v652_v12 = vsel %vm265_vm6, %v651_v10, %v647_v9 }
 0x5bd   :  { %v655_v13 = vsel %vm654_vm8, %v652_v12, 0.0 }
 0x5be   :  { %656 = vadd.xlane.f32.xlu1 %v655_v13 }
 0x647   :  { %v657_v14 = vpop.xlane.xlu1 %656 }
 0x648   :  { %v659_v15 = vmul.f32 0.03125, %v657_v14 }
 0x64a   :  { %v661_v16 = vrot.slane %v659_v15, 1  ;;  %v664_v18 = vsub.f32 %v647_v9, %v659_v15 }
 0x64c   :  { %v665_v19 = vsub.f32 %v648_v7, %v661_v16  ;;  %v666_v21 = vmul.f32 %v664_v18, %v664_v18 }
 0x64e   :  { %v667_v20 = vmul.f32 %v665_v19, %v665_v19 }
 0x650   :  { %v670_v22 = vrot.slane %v667_v20, 7 }
 0x652   :  { %v671_v35 = vsel %vm265_vm6, %v670_v22, %v666_v21 }
 0x653   :  { %v673_v31 = vsel %vm654_vm8, %v671_v35, 0.0 }
 0x654   :  { %674 = vadd.xlane.f32.xlu0 %v673_v31 }
 0x6dd   :  { %v675_v25 = vpop.xlane.xlu0 %674 }
 0x6de   :  { %v676_v26 = vmul.f32 0.03125, %v675_v25 }
 0x6e0   :  { %v677_v27 = vadd.f32 1e-05, %v676_v26 }
 0x6e2   :  { %1170 = vrsqrt.f32 %v677_v27 }
 0x6ef   :  { %v1171_v32 = vpop.eup %1170 }
 0x6f0   :  { %v680_v33 = vrot.slane %v1171_v32, 1  ;;  %v683_v34 = vmul.f32 %v1171_v32, %v664_v18  ;;  %v894_v32 = vrot.slane %v1378_v28, %v893_v29 }
 0x6f2   :  { %v684_v37 = vmul.f32 %v680_v33, %v665_v19  ;;  %v689_v38 = vmul.f32 %v688_v30, %v683_v34 }
 0x6f4   :  { %v690_v39 = vmul.f32 %v688_v30, %v684_v37  ;;  %v695_v40 = vadd.f32 %v694_v36, %v689_v38  ;;  %v899_v30 = vsub.s32 3, %v1242_v5 }
 0x6f6   :  { %v696_v41 = vadd.f32 %v694_v36, %v690_v39  ;;  %v697_v42 = vpack.c.bf16 %v695_v40, %v695_v40  ;;  %v900_v37 = vrot.slane %v1378_v28, %v899_v30 }
 0x6f8   :  { %v698_v43 = vpack.c.bf16 %v696_v41, %v696_v41  ;;  %v705_v45 = vunpack.c.l.b16 %v697_v42 }
 0x6fa   :  { %v706_v44 = vunpack.c.l.b16 %v698_v43 }
 0x6fc   :  { %v707_v46 = vrot.slane %v706_v44, 7 }
 0x6fe   :  { %v708_v47 = vsel %vm265_vm6, %v707_v46, %v705_v45 }
 0x6ff   :  { %v709_v48 = vpack.c.b16 %v708_v47, %v708_v47 }
 0x701   :  { %1118 = vmatmul.mubr.msk.bf16.vlgmr.msra.gmra.mxu0 %vm62_vm5, %v709_v48  ;;  %v1015_v48 = vld [vmem:[%s1436_s10] ss:$0 sm:$0xff] }
 0x702   :  { %1137 = vmatprep.mubr.msk.bf16.mxu0 %vm1179_vm1, %v1178_v4  ;;  %1134 = vmatpush3.bf16.msra.mxu0 %v1160_v23 }
 0x703   :  { %1135 = vmatprep.subr.bf16.mxu0 %v1178_v4 }
 0x706   :  { %1136 = vmatpush3.bf16.msra.mxu0 %v1161_v24 }
 0x7c1   :  { %v759_v52 = vpop.f32.mrf.mxu0 }
 0x7c2   :  { %v765_v53 = vmul.f32 %v759_v52, %v759_v52 }
 0x7c3   :  { %v1119_v54 = vpop.f32.mrf.mxu0 }
 0x7c4   :  { %v766_v55 = vmul.f32 %v765_v53, %v759_v52 }
 0x7c5   :  { %v762_v56 = vpop.f32.mrf.mxu0 }
 0x7c6   :  { %v767_v57 = vmul.f32 0.044715, %v766_v55 }
 0x7c7   :  { %v1120_v58 = vpop.f32.mrf.mxu0 }
 0x7c8   :  { %v768_v59 = vadd.f32 %v767_v57, %v759_v52 }
 0x7ca   :  { %v769_v60 = vmul.f32 0.7978846, %v768_v59 }
 0x7cc   :  { %1172 = vtanh.f32 %v769_v60 }
 0x7d9   :  { %v1173_v61 = vpop.eup %1172 }
 0x7da   :  { %v771_v62 = vadd.f32 1.0, %v1173_v61 }
 0x7dc   :  { %v772_v63 = vmul.f32 0.5, %v771_v62 }
 0x7de   :  { %v773_v0 = vmul.f32 %v772_v63, %v759_v52 }
 0x7e0   :  { %v774_v1 = vpack.c.bf16 %v773_v0, %v773_v0 }
 0x7e2   :  { %1130 = vmatmul.mubr.msk.bf16.vlgmr.msra.gmra.mxu1 %vm807_vm9, %v774_v1 }
 0x8a2   :  { %v845_v2 = vpop.f32.mrf.mxu1 }
 0x8a3   :  { %v852_v3 = vrot.slane %v845_v2, 1  ;;  %v855_v9 = vadd.f32 %v845_v2, %v695_v40 }
 0x8a4   :  { %v1131_v6 = vpop.f32.mrf.mxu1 }
 0x8a5   :  { %v856_v7 = vadd.f32 %v852_v3, %v696_v41 }
 0x8a6   :  { %v848_v8 = vpop.f32.mrf.mxu1 }
 0x8a7   :  { %v859_v10 = vrot.slane %v856_v7, 7 }
 0x8a8   :  { %v1132_v11 = vpop.f32.mrf.mxu1 }
 0x8a9   :  { %v860_v12 = vsel %vm265_vm6, %v859_v10, %v855_v9 }
 0x8aa   :  { %v862_v13 = vsel %vm654_vm8, %v860_v12, 0.0 }
 0x8ab   :  { %863 = vadd.xlane.f32.xlu0 %v862_v13 }
 0x934   :  { %v864_v14 = vpop.xlane.xlu0 %863 }
 0x935   :  { %v865_v15 = vmul.f32 0.03125, %v864_v14 }
 0x937   :  { %v867_v16 = vrot.slane %v865_v15, 1  ;;  %v870_v18 = vsub.f32 %v855_v9, %v865_v15 }
 0x939   :  { %v871_v19 = vsub.f32 %v856_v7, %v867_v16  ;;  %v872_v21 = vmul.f32 %v870_v18, %v870_v18 }
 0x93b   :  { %v873_v20 = vmul.f32 %v871_v19, %v871_v19 }
 0x93d   :  { %v876_v22 = vrot.slane %v873_v20, 7 }
 0x93f   :  { %v877_v35 = vsel %vm265_vm6, %v876_v22, %v872_v21 }
 0x940   :  { %v879_v31 = vsel %vm654_vm8, %v877_v35, 0.0 }
 0x941   :  { %880 = vadd.xlane.f32.xlu0 %v879_v31 }
 0x9ca   :  { %v881_v25 = vpop.xlane.xlu0 %880 }
 0x9cb   :  { %v882_v26 = vmul.f32 0.03125, %v881_v25 }
 0x9cd   :  { %v883_v27 = vadd.f32 1e-05, %v882_v26 }
 0x9cf   :  { %1174 = vrsqrt.f32 %v883_v27 }
 0x9dc   :  { %v1175_v33 = vpop.eup %1174 }
 0x9dd   :  { %v886_v34 = vrot.slane %v1175_v33, 1  ;;  %v889_v36 = vmul.f32 %v1175_v33, %v870_v18 }
 0x9df   :  { %v890_v38 = vmul.f32 %v886_v34, %v871_v19  ;;  %v895_v39 = vmul.f32 %v894_v32, %v889_v36 }
 0x9e1   :  { %v896_v40 = vmul.f32 %v894_v32, %v890_v38  ;;  %v901_v4 = vadd.f32 %v900_v37, %v895_v39 }
 0x9e3   :  { %v902_v41 = vadd.f32 %v900_v37, %v896_v40  ;;  %v903_v42 = vpack.c.bf16 %v901_v4, %v901_v4 }
 0x9e5   :  { %v904_v43 = vpack.c.bf16 %v902_v41, %v902_v41  ;;  %v918_v45 = vunpack.c.l.b16 %v903_v42 }
 0x9e7   :  { %v919_v44 = vunpack.c.l.b16 %v904_v43 }
 0x9e9   :  { %v920_v46 = vrot.slane %v919_v44, 7 }
 0x9eb   :  { %v921_v47 = vsel %vm265_vm6, %v920_v46, %v918_v45 }
 0x9ec   :  { %v922_v5 = vpack.c.b16 %v921_v47, %v921_v47 }
 0x9ee   :  { %1138 = vmatmul.mubr.msk.bf16.vlgmr.msra.gmra.mxu0 %vm62_vm5, %v922_v5 }
 0xaae   :  { %v972_v28 = vpop.f32.mrf.mxu0 }
 0xaaf   :  { %v973_v17 = vadd.f32 %v1015_v48, %v972_v28 }
 0xab0   :  { %v1139_v49 = vpop.f32.mrf.mxu0 }
 0xab1   :  { %978 = vst [vmem:[%s1437_s11] sm:$0x3] %v973_v17 }
 0xab2   :  { %v975_v50 = vpop.f32.mrf.mxu0 }
 0xab4   :  { %v1140_v51 = vpop.f32.mrf.mxu0 }

</bundles_post_ra>
